<compile_context>
chip_gen: v6e
topology: v6e:2x2x1
jax: 0.10.0
libtpu: 0.0.40
codegen_flags: <defaults>
</compile_context>

<pallas_src>
import jax
import jax.numpy as jnp
from jax.experimental import pallas as pl
from jax.experimental.pallas import tpu as pltpu

LANE = 128
SUBLANE_BF16 = 16        # bf16 packs 16 rows per vreg sublane group
MAX_TILE_B = 1024        # large tiles amortize per-grid-step overhead


def _round_up(n, m):
    return ((n + m - 1) // m) * m


def _cdiv(a, b):
    return (a + b - 1) // b


def actor_kernel(x_ref, w1_ref, b1_ref, w2_ref, b2_ref, w3_ref, b3_ref, o_ref):
    # Layer 1: Linear + ReLU (bf16 operands straight from the DMA'd tile,
    # f32 MXU accumulation).
    h1 = jnp.dot(x_ref[...], w1_ref[...], preferred_element_type=jnp.float32)
    h1 = jnp.maximum(h1 + b1_ref[...], 0.0)
    # Layer 2: Linear + ReLU
    h2 = jnp.dot(h1.astype(jnp.bfloat16), w2_ref[...],
                 preferred_element_type=jnp.float32)
    h2 = jnp.maximum(h2 + b2_ref[...], 0.0)
    # Layer 3: Linear + tanh; lane-padded bf16 output -> unmasked, lane-dense
    # store with half the write-back bytes.
    h3 = jnp.dot(h2.astype(jnp.bfloat16), w3_ref[...],
                 preferred_element_type=jnp.float32)
    o_ref[...] = jnp.tanh(h3 + b3_ref[...]).astype(o_ref.dtype)


def init_actor_params(key, obs_size, action_size,
                      hidden1_size=400, hidden2_size=300):
    """Mirrors the PyTorch module's parameter shapes / init style.
    Weights stored transposed: [in_features, out_features], float32."""
    ks = jax.random.split(key, 6)

    def uniform(k, shape, lim):
        return jax.random.uniform(k, shape, jnp.float32, -lim, lim)

    lim1 = 1.0 / (obs_size ** 0.5)        # fan_in-style limits (hidden_init)
    lim2 = 1.0 / (hidden1_size ** 0.5)
    lim3 = 0.003
    return {
        "w1": uniform(ks[0], (obs_size, hidden1_size), lim1),
        "b1": uniform(ks[1], (1, hidden1_size), lim1),
        "w2": uniform(ks[2], (hidden1_size, hidden2_size), lim2),
        "b2": uniform(ks[3], (1, hidden2_size), lim2),
        "w3": uniform(ks[4], (hidden2_size, action_size), lim3),
        "b3": uniform(ks[5], (1, action_size), lim3),
    }


def prepare_params(params):
    """Zero-pad all feature dims to multiples of 128 and cast weights to
    bfloat16 (biases stay f32).  Zero padding preserves the forward math."""
    def pad2(a, r, c, dtype):
        out = jnp.zeros((r, c), dtype)
        return out.at[:a.shape[0], :a.shape[1]].set(a.astype(dtype))

    obs, h1 = params["w1"].shape
    h2 = params["w2"].shape[1]
    act = params["w3"].shape[1]
    obs_p, h1_p, h2_p, act_p = (_round_up(d, LANE) for d in (obs, h1, h2, act))
    return {
        "w1": pad2(params["w1"], obs_p, h1_p, jnp.bfloat16),
        "b1": pad2(params["b1"], 1, h1_p, jnp.float32),
        "w2": pad2(params["w2"], h1_p, h2_p, jnp.bfloat16),
        "b2": pad2(params["b2"], 1, h2_p, jnp.float32),
        "w3": pad2(params["w3"], h2_p, act_p, jnp.bfloat16),
        "b3": pad2(params["b3"], 1, act_p, jnp.float32),
        "obs_size": obs,
        "action_size": act,
    }


def _choose_batch_tiling(B):
    """Pick (tile_b, n_tiles) so that:
       * tiles are <= MAX_TILE_B rows (amortize ~0.35us/step overhead),
       * B > 16 always yields >= 2 tiles (v7x: both TensorCores busy via
         dimension_semantics=("parallel",)),
       * padding waste stays below one bf16 sublane group (16 rows/tile)."""
    if B <= SUBLANE_BF16:
        n_tiles = 1
    else:
        n_tiles = max(2, _cdiv(B, MAX_TILE_B))
    tile_b = _round_up(_cdiv(B, n_tiles), SUBLANE_BF16)
    return tile_b, n_tiles


def actor_forward(x, p):
    """x: [B, obs_size] float32.  p: output of prepare_params().
    Returns [B, action_size] float32."""
    B, obs = x.shape
    obs_p, h1_p = p["w1"].shape
    h2_p = p["w2"].shape[1]
    act_p = p["w3"].shape[1]
    act = p["action_size"]

    tile_b, n_tiles = _choose_batch_tiling(B)
    b_pad = tile_b * n_tiles

    # Pad + cast x to bf16 in the wrapper (halves the x DMA per tile and
    # removes an in-kernel VPU pack).  Zero rows/lanes are harmless.
    x_in = jnp.zeros((b_pad, obs_p), jnp.bfloat16).at[:B, :obs].set(
        x.astype(jnp.bfloat16))

    grid = (n_tiles,)
    const = lambda i: (0, 0)          # weights/biases: same block every step
    batch_map = lambda i: (i, 0)      # x / out: march over batch tiles

    w_elems = obs_p * h1_p + h1_p * h2_p + h2_p * act_p
    cost = pl.CostEstimate(
        flops=2 * b_pad * w_elems,
        transcendentals=b_pad * act_p,
        bytes_accessed=(x_in.size * 2                 # bf16 x
                        + b_pad * act_p * 2           # bf16 out
                        + 2 * w_elems                 # bf16 weights
                        + 4 * (h1_p + h2_p + act_p)), # f32 biases
    )

    out = pl.pallas_call(
        actor_kernel,
        out_shape=jax.ShapeDtypeStruct((b_pad, act_p), jnp.bfloat16),
        grid=grid,
        in_specs=[
            pl.BlockSpec((tile_b, obs_p), batch_map),
            # Weights/biases: constant index_map -> DMA'd once, VMEM-resident
            # across all batch tiles.  (A Buffered(1) pipeline_mode would
            # shave the redundant second buffer, but VMEM is nowhere near a
            # constraint here, so we keep the default for robustness.)
            pl.BlockSpec((obs_p, h1_p), const),
            pl.BlockSpec((1, h1_p), const),
            pl.BlockSpec((h1_p, h2_p), const),
            pl.BlockSpec((1, h2_p), const),
            pl.BlockSpec((h2_p, act_p), const),
            pl.BlockSpec((1, act_p), const),
        ],
        out_specs=pl.BlockSpec((tile_b, act_p), batch_map),
        compiler_params=pltpu.CompilerParams(
            dimension_semantics=("parallel",),
            vmem_limit_bytes=32 * 1024 * 1024,
        ),
        cost_estimate=cost,
    )(x_in, p["w1"], p["b1"], p["w2"], p["b2"], p["w3"], p["b3"])

    # Slice off padded rows / lanes, hand back f32 to the caller.
    return out[:B, :act].astype(jnp.float32)


def actor_reference(x, p):
    """Pure-JAX f32 reference on the raw (unpadded, f32) params."""
    h1 = jnp.maximum(x @ p["w1"] + p["b1"], 0.0)
    h2 = jnp.maximum(h1 @ p["w2"] + p["b2"], 0.0)
    return jnp.tanh(h2 @ p["w3"] + p["b3"])


if __name__ == "__main__":
    obs_size, action_size = 32, 4

    key = jax.random.PRNGKey(0)
    k_x, k_x2, k_p = jax.random.split(key, 3)
    raw_params = init_actor_params(k_p, obs_size, action_size)
    params = prepare_params(raw_params)

    # Small RL-style batch (single grid tile).
    batch = 8
    x = jax.random.normal(k_x, (batch, obs_size), jnp.float32)
    out = jax.block_until_ready(actor_forward(x, params))
    ref = actor_reference(x, raw_params)
    assert out.shape == (batch, action_size)
    # bf16 weights/activations/output -> compare against the f32 reference
    # with a loose tolerance (~3 decimal digits, fine for an RL actor).
    assert jnp.allclose(out, ref, atol=1e-2, rtol=2e-2), float(
        jnp.max(jnp.abs(out - ref)))

    # Batch that exercises the multi-tile (>=2 grid steps) path.
    batch2 = 40
    x2 = jax.random.normal(k_x2, (batch2, obs_size), jnp.float32)
    out2 = jax.block_until_ready(actor_forward(x2, params))
    ref2 = actor_reference(x2, raw_params)
    assert out2.shape == (batch2, action_size)
    assert jnp.allclose(out2, ref2, atol=1e-2, rtol=2e-2), float(
        jnp.max(jnp.abs(out2 - ref2)))

    print("KERNEL_OK")
</pallas_src>

<mosaic_0001>
module attributes {stable_mosaic.version = 11 : i64} {
  func.func @actor_kernel(%arg0: i32, %arg1: memref<16x128xbf16, #tpu.memory_space<vmem>>, %arg2: memref<128x512xbf16, #tpu.memory_space<vmem>>, %arg3: memref<1x512xf32, #tpu.memory_space<vmem>>, %arg4: memref<512x384xbf16, #tpu.memory_space<vmem>>, %arg5: memref<1x384xf32, #tpu.memory_space<vmem>>, %arg6: memref<384x128xbf16, #tpu.memory_space<vmem>>, %arg7: memref<1x128xf32, #tpu.memory_space<vmem>>, %arg8: memref<16x128xbf16, #tpu.memory_space<vmem>>) attributes {dimension_semantics = [#tpu.dimension_semantics<parallel>], iteration_bounds = array<i64: 1>, scalar_prefetch = 0 : i64, scratch_operands = 0 : i64, tpu.core_type = #tpu.core_type<tc>, window_params = [{transform_indices = @transform_0, window_bounds = array<i64: 16, 128>}, {pipeline_mode = #tpu.pipeline_mode<synchronous>, transform_indices = @transform_1, window_bounds = array<i64: 128, 512>}, {pipeline_mode = #tpu.pipeline_mode<synchronous>, transform_indices = @transform_2, window_bounds = array<i64: 1, 512>}, {pipeline_mode = #tpu.pipeline_mode<synchronous>, transform_indices = @transform_3, window_bounds = array<i64: 512, 384>}, {pipeline_mode = #tpu.pipeline_mode<synchronous>, transform_indices = @transform_4, window_bounds = array<i64: 1, 384>}, {pipeline_mode = #tpu.pipeline_mode<synchronous>, transform_indices = @transform_5, window_bounds = array<i64: 384, 128>}, {pipeline_mode = #tpu.pipeline_mode<synchronous>, transform_indices = @transform_6, window_bounds = array<i64: 1, 128>}, {transform_indices = @transform_7, window_bounds = array<i64: 16, 128>}]} {
    %c0 = arith.constant 0 : index
    %c0_0 = arith.constant 0 : index
    %0 = vector.load %arg1[%c0, %c0_0] : memref<16x128xbf16, #tpu.memory_space<vmem>>, vector<16x128xbf16>
    %c0_1 = arith.constant 0 : index
    %c0_2 = arith.constant 0 : index
    %1 = vector.load %arg2[%c0_1, %c0_2] : memref<128x512xbf16, #tpu.memory_space<vmem>>, vector<128x512xbf16>
    %cst = arith.constant dense<0.000000e+00> : vector<16x512xf32>
    %2 = tpu.matmul %0, %1, %cst {dimension_numbers = #tpu.dot_dimension_numbers<[1], [0], [0], [1], [0, 0, 1, 1], [], []>} : vector<16x128xbf16>, vector<128x512xbf16>, vector<16x512xf32> -> vector<16x512xf32>
    %c0_3 = arith.constant 0 : index
    %c0_4 = arith.constant 0 : index
    %3 = vector.load %arg3[%c0_3, %c0_4] : memref<1x512xf32, #tpu.memory_space<vmem>>, vector<1x512xf32>
    %4 = vector.broadcast %3 : vector<1x512xf32> to vector<16x512xf32>
    %5 = arith.addf %2, %4 : vector<16x512xf32>
    %cst_5 = arith.constant 0.000000e+00 : f32
    %6 = vector.broadcast %cst_5 : f32 to vector<16x512xf32>
    %7 = arith.maximumf %5, %6 : vector<16x512xf32>
    %8 = arith.truncf %7 : vector<16x512xf32> to vector<16x512xbf16>
    %c0_6 = arith.constant 0 : index
    %c0_7 = arith.constant 0 : index
    %9 = vector.load %arg4[%c0_6, %c0_7] : memref<512x384xbf16, #tpu.memory_space<vmem>>, vector<512x384xbf16>
    %cst_8 = arith.constant dense<0.000000e+00> : vector<16x384xf32>
    %10 = tpu.matmul %8, %9, %cst_8 {dimension_numbers = #tpu.dot_dimension_numbers<[1], [0], [0], [1], [0, 0, 1, 1], [], []>} : vector<16x512xbf16>, vector<512x384xbf16>, vector<16x384xf32> -> vector<16x384xf32>
    %c0_9 = arith.constant 0 : index
    %c0_10 = arith.constant 0 : index
    %11 = vector.load %arg5[%c0_9, %c0_10] : memref<1x384xf32, #tpu.memory_space<vmem>>, vector<1x384xf32>
    %12 = vector.broadcast %11 : vector<1x384xf32> to vector<16x384xf32>
    %13 = arith.addf %10, %12 : vector<16x384xf32>
    %cst_11 = arith.constant 0.000000e+00 : f32
    %14 = vector.broadcast %cst_11 : f32 to vector<16x384xf32>
    %15 = arith.maximumf %13, %14 : vector<16x384xf32>
    %16 = arith.truncf %15 : vector<16x384xf32> to vector<16x384xbf16>
    %c0_12 = arith.constant 0 : index
    %c0_13 = arith.constant 0 : index
    %17 = vector.load %arg6[%c0_12, %c0_13] : memref<384x128xbf16, #tpu.memory_space<vmem>>, vector<384x128xbf16>
    %cst_14 = arith.constant dense<0.000000e+00> : vector<16x128xf32>
    %18 = tpu.matmul %16, %17, %cst_14 {dimension_numbers = #tpu.dot_dimension_numbers<[1], [0], [0], [1], [0, 0, 1, 1], [], []>} : vector<16x384xbf16>, vector<384x128xbf16>, vector<16x128xf32> -> vector<16x128xf32>
    %c0_15 = arith.constant 0 : index
    %c0_16 = arith.constant 0 : index
    %19 = vector.load %arg7[%c0_15, %c0_16] : memref<1x128xf32, #tpu.memory_space<vmem>>, vector<1x128xf32>
    %20 = vector.broadcast %19 : vector<1x128xf32> to vector<16x128xf32>
    %21 = arith.addf %18, %20 : vector<16x128xf32>
    %22 = math.tanh %21 : vector<16x128xf32>
    %23 = arith.truncf %22 : vector<16x128xf32> to vector<16x128xbf16>
    %c0_17 = arith.constant 0 : index
    %c0_18 = arith.constant 0 : index
    %24 = vector.load %arg8[%c0_17, %c0_18] : memref<16x128xbf16, #tpu.memory_space<vmem>>, vector<16x128xbf16>
    tpu.vector_store %arg8[%c0_17, %c0_18], %23 {strides = array<i32>} : memref<16x128xbf16, #tpu.memory_space<vmem>>, vector<16x128xbf16>,
    return
  }
  func.func @transform_0(%arg0: i32) -> (i32, i32) {
    %c0_i32 = arith.constant 0 : i32
    %c0_i32_0 = arith.constant 0 : i32
    return %arg0, %c0_i32 : i32, i32
  }
  func.func @transform_1(%arg0: i32) -> (i32, i32) {
    %c0_i32 = arith.constant 0 : i32
    %c0_i32_0 = arith.constant 0 : i32
    %c0_i32_1 = arith.constant 0 : i32
    return %c0_i32, %c0_i32_0 : i32, i32
  }
  func.func @transform_2(%arg0: i32) -> (i32, i32) {
    %c0_i32 = arith.constant 0 : i32
    %c0_i32_0 = arith.constant 0 : i32
    %c0_i32_1 = arith.constant 0 : i32
    return %c0_i32, %c0_i32_0 : i32, i32
  }
  func.func @transform_3(%arg0: i32) -> (i32, i32) {
    %c0_i32 = arith.constant 0 : i32
    %c0_i32_0 = arith.constant 0 : i32
    %c0_i32_1 = arith.constant 0 : i32
    return %c0_i32, %c0_i32_0 : i32, i32
  }
  func.func @transform_4(%arg0: i32) -> (i32, i32) {
    %c0_i32 = arith.constant 0 : i32
    %c0_i32_0 = arith.constant 0 : i32
    %c0_i32_1 = arith.constant 0 : i32
    return %c0_i32, %c0_i32_0 : i32, i32
  }
  func.func @transform_5(%arg0: i32) -> (i32, i32) {
    %c0_i32 = arith.constant 0 : i32
    %c0_i32_0 = arith.constant 0 : i32
    %c0_i32_1 = arith.constant 0 : i32
    return %c0_i32, %c0_i32_0 : i32, i32
  }
  func.func @transform_6(%arg0: i32) -> (i32, i32) {
    %c0_i32 = arith.constant 0 : i32
    %c0_i32_0 = arith.constant 0 : i32
    %c0_i32_1 = arith.constant 0 : i32
    return %c0_i32, %c0_i32_0 : i32, i32
  }
  func.func @transform_7(%arg0: i32) -> (i32, i32) {
    %c0_i32 = arith.constant 0 : i32
    %c0_i32_0 = arith.constant 0 : i32
    return %arg0, %c0_i32 : i32, i32
  }
}

</mosaic_0001>

<bundles_post_ra>
// kernel: tpu_custom_call.1
= control target key start
LH: loop header
LB: loop body
LE: loop exit
PB: predicated region body
PF: predicated region fallthrough
CT: control target
= control target key end

     0   :  { %12 = vsyncpa [#allocation3], 0  ;;  %s2280_s0 = inlined_call_operand.hbm [shape: bf16[16,128], index: 0, kind: input, shape index: {}]   ;;  %s2281_s1 = inlined_call_operand.hbm [shape: bf16[128,512], index: 1, kind: input, shape index: {}]   ;;  %s2282_s2 = inlined_call_operand.hbm [shape: f32[1,512], index: 2, kind: input, shape index: {}]   ;;  %s2283_s3 = inlined_call_operand.hbm [shape: bf16[512,384], index: 3, kind: input, shape index: {}]   ;;  %s2284_s4 = inlined_call_operand.vmem [shape: f32[1,384], index: 4, kind: input, shape index: {}]   ;;  %s2285_s5 = inlined_call_operand.hbm [shape: bf16[384,128], index: 5, kind: input, shape index: {}]   ;;  %s2286_s6 = inlined_call_operand.vmem [shape: f32[1,128], index: 6, kind: input, shape index: {}]   ;;  %s2287_s7 = inlined_call_operand.hbm [shape: bf16[16,128], index: 7, kind: output, shape index: {}]  }
   0x1   :  { %13 = vsyncpa [#allocation6], 0 }
   0x2   :  { %14 = vsyncpa [#allocation9], 0 }
   0x3   :  { %15 = vsyncpa [#allocation4], 0  ;;  %s2166_s24 = smov [#allocation5]  }
   0x4   :  { %s33_s25 = sshll.u32 %s2166_s24, 4  ;;  %s34_s25 = int_to_ptr.vmem [resolvable:$true] %s33_s25 }
   0x5   :  { %s2046_s26 = scalar_lea.vmem %s34_s25, 4096  ;;  %p2051_p1 = scmp.lt.s32.totalorder %s34_s25, %s34_s25 }
   0x6   :  { %p2047_p0 = scmp.ne.s32.totalorder %s34_s25, %s2046_s26  ;;  %p2052_p2 = scmp.lt.s32.totalorder %s2046_s26, %s2046_s26 }
   0x8   :  { %p2053_p3 = por %p2052_p2, %p2051_p1 }
   0xa   :  { %p2054_p4 = pnand %p2053_p3, %p2047_p0 }
   0xc   :  { %2057 = shalt.err (!%p2054_p4)
}
   0xd   :  { %s2167_s27 = smov 256   ;;  %s2168_s28 = smov 16  }
   0xe   :  { %39 = dma.hbm_to_vmem [thread:$0]  %s2281_s1, 4096, %s34_s25, [#allocation6], %s2167_s27, %s2167_s27, %s2168_s28  }
   0xf   :  { %s2169_s8 = smov [#allocation8]  }
  0x10   :  { %s55_s9 = sshll.u32 %s2169_s8, 4  ;;  %s56_s9 = int_to_ptr.vmem [resolvable:$true] %s55_s9 }
  0x11   :  { %s2066_s10 = scalar_lea.vmem %s56_s9, 12288  ;;  %p2071_p6 = scmp.lt.s32.totalorder %s56_s9, %s56_s9 }
  0x12   :  { %p2067_p5 = scmp.ne.s32.totalorder %s56_s9, %s2066_s10  ;;  %p2072_p7 = scmp.lt.s32.totalorder %s2066_s10, %s2066_s10 }
  0x14   :  { %p2073_p8 = por %p2072_p7, %p2071_p6 }
  0x16   :  { %p2074_p9 = pnand %p2073_p8, %p2067_p5 }
  0x18   :  { %2077 = shalt.err (!%p2074_p9)
}
  0x19   :  { %s2170_s11 = smov 192   ;;  %s2171_s12 = smov 12  }
  0x1a   :  { %61 = dma.hbm_to_vmem [thread:$0]  %s2283_s3, 12288, %s56_s9, [#allocation9], %s2170_s11, %s2170_s11, %s2171_s12  }
  0x1b   :  { %s2172_s15 = smov [#allocation2]  }
  0x1c   :  { %s21_s16 = sshll.u32 %s2172_s15, 4  ;;  %s22_s16 = int_to_ptr.vmem [resolvable:$true] %s21_s16 }
  0x1d   :  { %s2086_s1 = scalar_lea.vmem %s22_s16, 128  ;;  %p2091_p11 = scmp.lt.s32.totalorder %s22_s16, %s22_s16 }
  0x1e   :  { %p2087_p10 = scmp.ne.s32.totalorder %s22_s16, %s2086_s1  ;;  %p2092_p12 = scmp.lt.s32.totalorder %s2086_s1, %s2086_s1 }
  0x20   :  { %p2093_p13 = por %p2092_p12, %p2091_p11 }
  0x22   :  { %p2094_p0 = pnand %p2093_p13, %p2087_p10 }
  0x24   :  { %2097 = shalt.err (!%p2094_p0)
}
  0x25   :  { %s2173_s17 = smov 64   ;;  %s2174_s18 = smov 4  }
  0x26   :  { %27 = dma.hbm_to_vmem [thread:$0]  %s2280_s0, 128, %s22_s16, [#allocation3], %s2173_s17, %s2173_s17, %s2174_s18  }
  0x27   :  { %s2175_s3 = smov [#allocation7]   ;;  %s2176_s22 = smov [#allocation10]  }
  0x28   :  { %s46_s21 = sshll.u32 %s2175_s3, 4  ;;  %s69_s23 = sshll.u32 %s2176_s22, 4  ;;  %s47_s21 = int_to_ptr.vmem [resolvable:$true] %s46_s21  ;;  %s70_s23 = int_to_ptr.vmem [resolvable:$true] %s69_s23 }
  0x29   :  { %s2106_s24 = scalar_lea.vmem %s47_s21, 64  ;;  %p2111_p2 = scmp.lt.s32.totalorder %s47_s21, %s47_s21 }
  0x2a   :  { %p2107_p1 = scmp.ne.s32.totalorder %s47_s21, %s2106_s24  ;;  %p2112_p3 = scmp.lt.s32.totalorder %s2106_s24, %s2106_s24 }
  0x2c   :  { %p2113_p4 = por %p2112_p3, %p2111_p2 }
  0x2e   :  { %p2114_p5 = pnand %p2113_p4, %p2107_p1 }
  0x30   :  { %2117 = shalt.err (!%p2114_p5)
}
  0x31   :  { %49 = dma.hbm_to_vmem [thread:$0]  %s2282_s2, 64, %s47_s21, [#allocation6]  }
  0x32   :  { %s2126_s27 = scalar_lea.vmem %s70_s23, 3072  ;;  %p2131_p7 = scmp.lt.s32.totalorder %s70_s23, %s70_s23 }
  0x33   :  { %p2127_p6 = scmp.ne.s32.totalorder %s70_s23, %s2126_s27  ;;  %p2132_p8 = scmp.lt.s32.totalorder %s2126_s27, %s2126_s27 }
  0x35   :  { %p2133_p9 = por %p2132_p8, %p2131_p7 }
  0x37   :  { %p2134_p10 = pnand %p2133_p9, %p2127_p6 }
  0x39   :  { %2137 = shalt.err (!%p2134_p10)
}
  0x3a   :  { %75 = dma.hbm_to_vmem [thread:$0]  %s2285_s5, 3072, %s70_s23, [#allocation9], %s2173_s17, %s2173_s17, %s2174_s18  }
  0x3b   :  { %2158 = dma.done.wait [#allocation3], 128  }
  0x3c   :  { %2159 = vsyncadd [#allocation3], 4294967168 }
  0x3d   :  { %2160 = dma.done.wait [#allocation6], 4160  }
  0x3e   :  { %2161 = vsyncadd [#allocation6], 4294963136 }
  0x3f   :  { %2162 = dma.done.wait [#allocation9], 15360  }
  0x40   :  { %2163 = vsyncadd [#allocation9], 4294951936  ;;  %v2177_v0 = vmov 0   ;;  %v1833_v1 = vld [vmem:[#allocation5 + $0xe4] ss:$16 sps:$4 sm:$0xff]   ;;  %v1881_v35 = vld [vmem:[#allocation2] sm:$0xff]  }
  0x41   :  { %348 = vmatprep.mubr.bf16.mxu0 %v2177_v0  ;;  %391 = vmatprep.mubr.bf16.mxu1 %v2177_v0  ;;  %v1835_v2 = vld [vmem:[#allocation5 + $0xec] ss:$16 sps:$4 sm:$0xff]   ;;  %v1837_v3 = vld [vmem:[#allocation5 + $0xe0] ss:$16 sps:$4 sm:$0xff]   ;;  %v1838_v4 = vld [vmem:[#allocation5 + $0xe8] ss:$16 sps:$4 sm:$0xff]  }
  0x42   :  { %316 = vmatprep.subr.bf16.mxu0 %v1833_v1  ;;  %359 = vmatprep.subr.bf16.mxu1 %v1835_v2  ;;  %v1839_v5 = vld [vmem:[#allocation5 + $0xc4] ss:$16 sps:$4 sm:$0xff]   ;;  %v1841_v6 = vld [vmem:[#allocation5 + $0xcc] ss:$16 sps:$4 sm:$0xff]   ;;  %v1843_v7 = vld [vmem:[#allocation5 + $0xc0] ss:$16 sps:$4 sm:$0xff]  }
  0x43   :  { %317 = vmatpush1.bf16.msra.mxu0 %v1837_v3  ;;  %360 = vmatpush1.bf16.msra.mxu1 %v1838_v4  ;;  %v1844_v8 = vld [vmem:[#allocation5 + $0xc8] ss:$16 sps:$4 sm:$0xff]   ;;  %v1845_v9 = vld [vmem:[#allocation5 + $0xa4] ss:$16 sps:$4 sm:$0xff]   ;;  %v1847_v10 = vld [vmem:[#allocation5 + $0xac] ss:$16 sps:$4 sm:$0xff]  }
  0x44   :  { %318 = vmatprep.subr.bf16.mxu0 %v1839_v5  ;;  %361 = vmatprep.subr.bf16.mxu1 %v1841_v6  ;;  %v1849_v11 = vld [vmem:[#allocation5 + $0xa0] ss:$16 sps:$4 sm:$0xff]   ;;  %v1850_v12 = vld [vmem:[#allocation5 + $0xa8] ss:$16 sps:$4 sm:$0xff]   ;;  %v1851_v13 = vld [vmem:[#allocation5 + $0x84] ss:$16 sps:$4 sm:$0xff]  }
  0x45   :  { %v1853_v14 = vld [vmem:[#allocation5 + $0x8c] ss:$16 sps:$4 sm:$0xff]   ;;  %v1855_v15 = vld [vmem:[#allocation5 + $0x80] ss:$16 sps:$4 sm:$0xff]   ;;  %v1856_v16 = vld [vmem:[#allocation5 + $0x88] ss:$16 sps:$4 sm:$0xff]  }
  0x46   :  { %v1857_v17 = vld [vmem:[#allocation5 + $0x64] ss:$16 sps:$4 sm:$0xff]   ;;  %v1859_v18 = vld [vmem:[#allocation5 + $0x6c] ss:$16 sps:$4 sm:$0xff]   ;;  %v1861_v19 = vld [vmem:[#allocation5 + $0x60] ss:$16 sps:$4 sm:$0xff]  }
  0x47   :  { %319 = vmatpush1.bf16.msra.mxu0 %v1843_v7  ;;  %362 = vmatpush1.bf16.msra.mxu1 %v1844_v8  ;;  %v1862_v20 = vld [vmem:[#allocation5 + $0x68] ss:$16 sps:$4 sm:$0xff]   ;;  %v1863_v21 = vld [vmem:[#allocation5 + $0x44] ss:$16 sps:$4 sm:$0xff]   ;;  %v1865_v22 = vld [vmem:[#allocation5 + $0x4c] ss:$16 sps:$4 sm:$0xff]  }
  0x48   :  { %320 = vmatprep.subr.bf16.mxu0 %v1845_v9  ;;  %363 = vmatprep.subr.bf16.mxu1 %v1847_v10  ;;  %v1867_v23 = vld [vmem:[#allocation5 + $0x40] ss:$16 sps:$4 sm:$0xff]   ;;  %v1868_v24 = vld [vmem:[#allocation5 + $0x48] ss:$16 sps:$4 sm:$0xff]   ;;  %v1869_v25 = vld [vmem:[#allocation5 + $0x24] ss:$16 sps:$4 sm:$0xff]  }
  0x49   :  { %v1871_v26 = vld [vmem:[#allocation5 + $0x2c] ss:$16 sps:$4 sm:$0xff]   ;;  %v1873_v27 = vld [vmem:[#allocation5 + $0x20] ss:$16 sps:$4 sm:$0xff]   ;;  %v1874_v28 = vld [vmem:[#allocation5 + $0x28] ss:$16 sps:$4 sm:$0xff]  }
  0x4a   :  { %v1875_v29 = vld [vmem:[#allocation5 + $0x4] ss:$16 sps:$4 sm:$0xff]   ;;  %v1877_v30 = vld [vmem:[#allocation5 + $0xc] ss:$16 sps:$4 sm:$0xff]   ;;  %v1879_v31 = vld [vmem:[#allocation5] ss:$16 sps:$4 sm:$0xff]  }
  0x4b   :  { %321 = vmatpush1.bf16.msra.mxu0 %v1849_v11  ;;  %364 = vmatpush1.bf16.msra.mxu1 %v1850_v12  ;;  %v1880_v32 = vld [vmem:[#allocation5 + $0x8] ss:$16 sps:$4 sm:$0xff]   ;;  %v1884_v33 = vld [vmem:[#allocation8 + $0xac] ss:$12 sps:$4 sm:$0xff]   ;;  %v1888_v40 = vld [vmem:[#allocation8 + $0x90] ss:$12 sps:$4 sm:$0xff]  }
  0x4c   :  { %322 = vmatprep.subr.bf16.mxu0 %v1851_v13  ;;  %365 = vmatprep.subr.bf16.mxu1 %v1853_v14  ;;  %v1887_v34 = vld [vmem:[#allocation8 + $0x22c] ss:$12 sps:$4 sm:$0xff]   ;;  %v1882_v36 = vld [vmem:[#allocation8 + $0xa8] ss:$12 sps:$4 sm:$0xff]   ;;  %v1891_v41 = vld [vmem:[#allocation8 + $0x210] ss:$12 sps:$4 sm:$0xff]  }
  0x4d   :  { %v1885_v37 = vld [vmem:[#allocation8 + $0x228] ss:$12 sps:$4 sm:$0xff]   ;;  %v1894_v44 = vld [vmem:[#allocation8 + $0x78] ss:$12 sps:$4 sm:$0xff]   ;;  %v1900_v48 = vld [vmem:[#allocation8 + $0x60] ss:$12 sps:$4 sm:$0xff]  }
  0x4e   :  { %v1890_v38 = vld [vmem:[#allocation8 + $0x94] ss:$12 sps:$4 sm:$0xff]   ;;  %v1896_v42 = vld [vmem:[#allocation8 + $0x7c] ss:$12 sps:$4 sm:$0xff]   ;;  %v1897_v45 = vld [vmem:[#allocation8 + $0x1f8] ss:$12 sps:$4 sm:$0xff]  }
  0x4f   :  { %323 = vmatpush1.bf16.msra.mxu0 %v1855_v15  ;;  %366 = vmatpush1.bf16.msra.mxu1 %v1856_v16  ;;  %v1893_v39 = vld [vmem:[#allocation8 + $0x214] ss:$12 sps:$4 sm:$0xff]   ;;  %v1899_v43 = vld [vmem:[#allocation8 + $0x1fc] ss:$12 sps:$4 sm:$0xff]   ;;  %v1902_v46 = vld [vmem:[#allocation8 + $0x64] ss:$12 sps:$4 sm:$0xff]  }
  0x50   :  { %324 = vmatprep.subr.bf16.mxu0 %v1857_v17  ;;  %367 = vmatprep.subr.bf16.mxu1 %v1859_v18  ;;  %v1905_v47 = vld [vmem:[#allocation8 + $0x1e4] ss:$12 sps:$4 sm:$0xff]   ;;  %v1903_v49 = vld [vmem:[#allocation8 + $0x1e0] ss:$12 sps:$4 sm:$0xff]   ;;  %v1906_v52 = vld [vmem:[#allocation8 + $0x48] ss:$12 sps:$4 sm:$0xff]  }
  0x51   :  { %v1908_v50 = vld [vmem:[#allocation8 + $0x4c] ss:$12 sps:$4 sm:$0xff]   ;;  %v1909_v53 = vld [vmem:[#allocation8 + $0x1c8] ss:$12 sps:$4 sm:$0xff]   ;;  %v1912_v56 = vld [vmem:[#allocation8 + $0x30] ss:$12 sps:$4 sm:$0xff]  }
  0x52   :  { %v1911_v51 = vld [vmem:[#allocation8 + $0x1cc] ss:$12 sps:$4 sm:$0xff]   ;;  %v1914_v54 = vld [vmem:[#allocation8 + $0x34] ss:$12 sps:$4 sm:$0xff]   ;;  %v1915_v57 = vld [vmem:[#allocation8 + $0x1b0] ss:$12 sps:$4 sm:$0xff]  }
  0x53   :  { %325 = vmatpush1.bf16.msra.mxu0 %v1861_v19  ;;  %368 = vmatpush1.bf16.msra.mxu1 %v1862_v20  ;;  %v1917_v55 = vld [vmem:[#allocation8 + $0x1b4] ss:$12 sps:$4 sm:$0xff]   ;;  %v1920_v58 = vld [vmem:[#allocation8 + $0x1c] ss:$12 sps:$4 sm:$0xff]   ;;  %v1918_v60 = vld [vmem:[#allocation8 + $0x18] ss:$12 sps:$4 sm:$0xff]  }
  0x54   :  { %326 = vmatprep.subr.bf16.mxu0 %v1863_v21  ;;  %369 = vmatprep.subr.bf16.mxu1 %v1865_v22  ;;  %v1923_v59 = vld [vmem:[#allocation8 + $0x19c] ss:$12 sps:$4 sm:$0xff]   ;;  %v1921_v61 = vld [vmem:[#allocation8 + $0x198] ss:$12 sps:$4 sm:$0xff]   ;;  %v1924_v0 = vld [vmem:[#allocation8] ss:$12 sps:$4 sm:$0xff]  }
  0x55   :  { %v1926_v62 = vld [vmem:[#allocation8 + $0x4] ss:$12 sps:$4 sm:$0xff]   ;;  %v1927_v1 = vld [vmem:[#allocation8 + $0x180] ss:$12 sps:$4 sm:$0xff]   ;;  %v1930_v4 = vld [vmem:[#allocation8 + $0x168] ss:$12 sps:$4 sm:$0xff]  }
  0x56   :  { %v1929_v63 = vld [vmem:[#allocation8 + $0x184] ss:$12 sps:$4 sm:$0xff]   ;;  %v1932_v2 = vld [vmem:[#allocation8 + $0x16c] ss:$12 sps:$4 sm:$0xff]   ;;  %v1933_v5 = vld [vmem:[#allocation8 + $0x2e8] ss:$12 sps:$4 sm:$0xff]  }
  0x57   :  { %327 = vmatpush1.bf16.msra.mxu0 %v1867_v23  ;;  %370 = vmatpush1.bf16.msra.mxu1 %v1868_v24  ;;  %v1935_v3 = vld [vmem:[#allocation8 + $0x2ec] ss:$12 sps:$4 sm:$0xff]   ;;  %v1938_v6 = vld [vmem:[#allocation8 + $0x154] ss:$12 sps:$4 sm:$0xff]   ;;  %v1936_v8 = vld [vmem:[#allocation8 + $0x150] ss:$12 sps:$4 sm:$0xff]  }
  0x58   :  { %328 = vmatprep.subr.bf16.mxu0 %v1869_v25  ;;  %371 = vmatprep.subr.bf16.mxu1 %v1871_v26  ;;  %v1941_v7 = vld [vmem:[#allocation8 + $0x2d4] ss:$12 sps:$4 sm:$0xff]   ;;  %v1939_v9 = vld [vmem:[#allocation8 + $0x2d0] ss:$12 sps:$4 sm:$0xff]   ;;  %v1942_v12 = vld [vmem:[#allocation8 + $0x138] ss:$12 sps:$4 sm:$0xff]  }
  0x59   :  { %v1944_v10 = vld [vmem:[#allocation8 + $0x13c] ss:$12 sps:$4 sm:$0xff]   ;;  %v1945_v13 = vld [vmem:[#allocation8 + $0x2b8] ss:$12 sps:$4 sm:$0xff]   ;;  %v1948_v16 = vld [vmem:[#allocation8 + $0x120] ss:$12 sps:$4 sm:$0xff]  }
  0x5a   :  { %v1947_v11 = vld [vmem:[#allocation8 + $0x2bc] ss:$12 sps:$4 sm:$0xff]   ;;  %v1950_v14 = vld [vmem:[#allocation8 + $0x124] ss:$12 sps:$4 sm:$0xff]   ;;  %v1951_v17 = vld [vmem:[#allocation8 + $0x2a0] ss:$12 sps:$4 sm:$0xff]  }
  0x5b   :  { %329 = vmatpush1.bf16.msra.mxu0 %v1873_v27  ;;  %372 = vmatpush1.bf16.msra.mxu1 %v1874_v28  ;;  %v1953_v15 = vld [vmem:[#allocation8 + $0x2a4] ss:$12 sps:$4 sm:$0xff]   ;;  %v1956_v18 = vld [vmem:[#allocation8 + $0x10c] ss:$12 sps:$4 sm:$0xff]   ;;  %v1954_v20 = vld [vmem:[#allocation8 + $0x108] ss:$12 sps:$4 sm:$0xff]  }
  0x5c   :  { %330 = vmatprep.subr.bf16.mxu0 %v1875_v29  ;;  %373 = vmatprep.subr.bf16.mxu1 %v1877_v30  ;;  %v1959_v19 = vld [vmem:[#allocation8 + $0x28c] ss:$12 sps:$4 sm:$0xff]   ;;  %v1957_v21 = vld [vmem:[#allocation8 + $0x288] ss:$12 sps:$4 sm:$0xff]   ;;  %v1960_v24 = vld [vmem:[#allocation8 + $0xf0] ss:$12 sps:$4 sm:$0xff]  }
  0x5d   :  { %v1962_v22 = vld [vmem:[#allocation8 + $0xf4] ss:$12 sps:$4 sm:$0xff]   ;;  %v1963_v25 = vld [vmem:[#allocation8 + $0x270] ss:$12 sps:$4 sm:$0xff]   ;;  %v1966_v28 = vld [vmem:[#allocation8 + $0xd8] ss:$12 sps:$4 sm:$0xff]  }
  0x5e   :  { %v1965_v23 = vld [vmem:[#allocation8 + $0x274] ss:$12 sps:$4 sm:$0xff]   ;;  %v1968_v26 = vld [vmem:[#allocation8 + $0xdc] ss:$12 sps:$4 sm:$0xff]   ;;  %v1969_v29 = vld [vmem:[#allocation8 + $0x258] ss:$12 sps:$4 sm:$0xff]  }
  0x5f   :  { %331 = vmatpush1.bf16.msra.mxu0 %v1879_v31  ;;  %374 = vmatpush1.bf16.msra.mxu1 %v1880_v32  ;;  %v1971_v27 = vld [vmem:[#allocation8 + $0x25c] ss:$12 sps:$4 sm:$0xff]   ;;  %v1974_v30 = vld [vmem:[#allocation8 + $0xc4] ss:$12 sps:$4 sm:$0xff]   ;;  %v1972_v32 = vld [vmem:[#allocation8 + $0xc0] ss:$12 sps:$4 sm:$0xff]  }
  0x60   :  { %1071 = vmatprep.subr.bf16.mxu0 %v1884_v33  ;;  %1114 = vmatprep.subr.bf16.mxu1 %v1887_v34  ;;  %v1977_v31 = vld [vmem:[#allocation8 + $0x244] ss:$12 sps:$4 sm:$0xff]   ;;  %v1975_v33 = vld [vmem:[#allocation8 + $0x240] ss:$12 sps:$4 sm:$0xff]   ;;  %vm2179_vm0 = vmmov 0   ;;  %s2180_s30 = smov [#allocation11]  }
  0x61   :  { %v1978_v34 = vld [vmem:[#allocation8 + $0x170] ss:$12 sps:$4 sm:$0xff]   ;;  %s1546_s8 = sshll.u32 %s2180_s30, 4  ;;  %s1547_s8 = int_to_ptr.vmem [resolvable:$true] %s1546_s8 }
  0x62   :  { %349 = vmatmul.mubr.bf16.vlgmr.msra.gmra.mxu0 %v1881_v35  ;;  %392 = vmatmul.mubr.bf16.vlgmr.msra.gmra.mxu1 %v1881_v35  ;;  %v1979_v35 = vld [vmem:[#allocation8 + $0x2f0] ss:$12 sps:$4 sm:$0xff]   ;;  %s2138_s9 = scalar_lea.vmem %s1547_s8, 128  ;;  %p2143_p12 = scmp.lt.s32.totalorder %s1547_s8, %s1547_s8 }
  0x63   :  { %1072 = vmatpush1.bf16.msra.mxu0 %v1882_v36  ;;  %1115 = vmatpush1.bf16.msra.mxu1 %v1885_v37  ;;  %v130_v36 = vlaneseq  ;;  %p2139_p11 = scmp.ne.s32.totalorder %s1547_s8, %s2138_s9  ;;  %p2144_p13 = scmp.lt.s32.totalorder %s2138_s9, %s2138_s9 }
  0x64   :  { %1073 = vmatprep.subr.bf16.mxu0 %v1890_v38  ;;  %1116 = vmatprep.subr.bf16.mxu1 %v1893_v39 }
  0x65   :  { %v2242_v37 = vshrl.u32 %v130_v36, 7  ;;  %v2005_v36 = vld [vmem:[#allocation8 + $0x1a0] ss:$12 sps:$4 sm:$0xff]   ;;  %p2145_p0 = por %p2144_p13, %p2143_p12 }
  0x67   :  { %1074 = vmatpush1.bf16.msra.mxu0 %v1888_v40  ;;  %1117 = vmatpush1.bf16.msra.mxu1 %v1891_v41  ;;  %v136_v38 = vsub.s32 1, %v2242_v37  ;;  %v144_v39 = vsub.s32 3, %v2242_v37  ;;  %v132_v40 = vsub.s32 0, %v2242_v37  ;;  %v140_v41 = vsub.s32 2, %v2242_v37  ;;  %p2146_p1 = pnand %p2145_p0, %p2139_p11 }
  0x68   :  { %1075 = vmatprep.subr.bf16.mxu0 %v1896_v42  ;;  %1118 = vmatprep.subr.bf16.mxu1 %v1899_v43  ;;  %v128_v42 = vld [vmem:[#allocation7] sm:$0xf] }
  0x6b   :  { %1076 = vmatpush1.bf16.msra.mxu0 %v1894_v44  ;;  %1119 = vmatpush1.bf16.msra.mxu1 %v1897_v45  ;;  %v137_v45 = vrot.slane %v128_v42, %v136_v38 }
  0x6c   :  { %1077 = vmatprep.subr.bf16.mxu0 %v1902_v46  ;;  %1120 = vmatprep.subr.bf16.mxu1 %v1905_v47  ;;  %v145_v46 = vrot.slane %v128_v42, %v144_v39  ;;  %v133_v47 = vrot.slane %v128_v42, %v132_v40  ;;  %v2006_v39 = vld [vmem:[#allocation8 + $0xc8] ss:$12 sps:$4 sm:$0xff]  }
  0x6f   :  { %1078 = vmatpush1.bf16.msra.mxu0 %v1900_v48  ;;  %1121 = vmatpush1.bf16.msra.mxu1 %v1903_v49  ;;  %v141_v48 = vrot.slane %v128_v42, %v140_v41  ;;  %v2007_v42 = vld [vmem:[#allocation8 + $0x248] ss:$12 sps:$4 sm:$0xff]  }
  0x70   :  { %1079 = vmatprep.subr.bf16.mxu0 %v1908_v50  ;;  %1122 = vmatprep.subr.bf16.mxu1 %v1911_v51 }
  0x73   :  { %1080 = vmatpush1.bf16.msra.mxu0 %v1906_v52  ;;  %1123 = vmatpush1.bf16.msra.mxu1 %v1909_v53 }
  0x74   :  { %1081 = vmatprep.subr.bf16.mxu0 %v1914_v54  ;;  %1124 = vmatprep.subr.bf16.mxu1 %v1917_v55 }
  0x77   :  { %1082 = vmatpush1.bf16.msra.mxu0 %v1912_v56  ;;  %1125 = vmatpush1.bf16.msra.mxu1 %v1915_v57 }
  0x78   :  { %1083 = vmatprep.subr.bf16.mxu0 %v1920_v58  ;;  %1126 = vmatprep.subr.bf16.mxu1 %v1923_v59 }
  0x7b   :  { %1084 = vmatpush1.bf16.msra.mxu0 %v1918_v60  ;;  %1127 = vmatpush1.bf16.msra.mxu1 %v1921_v61 }
  0x7c   :  { %1085 = vmatprep.subr.bf16.mxu0 %v1926_v62  ;;  %1128 = vmatprep.subr.bf16.mxu1 %v1929_v63 }
  0x7f   :  { %1086 = vmatpush1.bf16.msra.mxu0 %v1924_v0  ;;  %1129 = vmatpush1.bf16.msra.mxu1 %v1927_v1 }
  0x80   :  { %1087 = vmatprep.subr.bf16.mxu0 %v1932_v2  ;;  %1130 = vmatprep.subr.bf16.mxu1 %v1935_v3 }
  0x83   :  { %1088 = vmatpush2.bf16.msra.mxu0 %v1930_v4  ;;  %1131 = vmatpush2.bf16.msra.mxu1 %v1933_v5 }
  0x84   :  { %1089 = vmatprep.subr.bf16.mxu0 %v1938_v6  ;;  %1132 = vmatprep.subr.bf16.mxu1 %v1941_v7 }
  0x87   :  { %1090 = vmatpush2.bf16.msra.mxu0 %v1936_v8  ;;  %1133 = vmatpush2.bf16.msra.mxu1 %v1939_v9  ;;  %v1980_v9 = vld [vmem:[#allocation8 + $0xb0] ss:$12 sps:$4 sm:$0xff]  }
  0x88   :  { %1091 = vmatprep.subr.bf16.mxu0 %v1944_v10  ;;  %1134 = vmatprep.subr.bf16.mxu1 %v1947_v11  ;;  %v1981_v10 = vld [vmem:[#allocation8 + $0x230] ss:$12 sps:$4 sm:$0xff]  }
  0x8b   :  { %1092 = vmatpush2.bf16.msra.mxu0 %v1942_v12  ;;  %1135 = vmatpush2.bf16.msra.mxu1 %v1945_v13  ;;  %v1982_v13 = vld [vmem:[#allocation8 + $0x158] ss:$12 sps:$4 sm:$0xff]  }
  0x8c   :  { %1093 = vmatprep.subr.bf16.mxu0 %v1950_v14  ;;  %1136 = vmatprep.subr.bf16.mxu1 %v1953_v15  ;;  %v1983_v14 = vld [vmem:[#allocation8 + $0x2d8] ss:$12 sps:$4 sm:$0xff]  }
  0x8d   :  { %v1984_v15 = vld [vmem:[#allocation8 + $0x98] ss:$12 sps:$4 sm:$0xff]  }
  0x8f   :  { %1094 = vmatpush2.bf16.msra.mxu0 %v1948_v16  ;;  %1137 = vmatpush2.bf16.msra.mxu1 %v1951_v17  ;;  %v1985_v16 = vld [vmem:[#allocation8 + $0x218] ss:$12 sps:$4 sm:$0xff]   ;;  %v1986_v17 = vld [vmem:[#allocation8 + $0x140] ss:$12 sps:$4 sm:$0xff]  }
  0x90   :  { %1095 = vmatprep.subr.bf16.mxu0 %v1956_v18  ;;  %1138 = vmatprep.subr.bf16.mxu1 %v1959_v19  ;;  %v1987_v18 = vld [vmem:[#allocation8 + $0x2c0] ss:$12 sps:$4 sm:$0xff]  }
  0x91   :  { %v1988_v19 = vld [vmem:[#allocation8 + $0x80] ss:$12 sps:$4 sm:$0xff]  }
  0x93   :  { %1096 = vmatpush2.bf16.msra.mxu0 %v1954_v20  ;;  %1139 = vmatpush2.bf16.msra.mxu1 %v1957_v21  ;;  %v1989_v20 = vld [vmem:[#allocation8 + $0x200] ss:$12 sps:$4 sm:$0xff]   ;;  %v1990_v21 = vld [vmem:[#allocation8 + $0x128] ss:$12 sps:$4 sm:$0xff]  }
  0x94   :  { %1097 = vmatprep.subr.bf16.mxu0 %v1962_v22  ;;  %1140 = vmatprep.subr.bf16.mxu1 %v1965_v23  ;;  %v1991_v22 = vld [vmem:[#allocation8 + $0x2a8] ss:$12 sps:$4 sm:$0xff]  }
  0x95   :  { %v1992_v23 = vld [vmem:[#allocation8 + $0x68] ss:$12 sps:$4 sm:$0xff]  }
  0x97   :  { %1098 = vmatpush2.bf16.msra.mxu0 %v1960_v24  ;;  %1141 = vmatpush2.bf16.msra.mxu1 %v1963_v25  ;;  %v1993_v24 = vld [vmem:[#allocation8 + $0x1e8] ss:$12 sps:$4 sm:$0xff]   ;;  %v1994_v25 = vld [vmem:[#allocation8 + $0x110] ss:$12 sps:$4 sm:$0xff]  }
  0x98   :  { %1099 = vmatprep.subr.bf16.mxu0 %v1968_v26  ;;  %1142 = vmatprep.subr.bf16.mxu1 %v1971_v27  ;;  %v1995_v26 = vld [vmem:[#allocation8 + $0x290] ss:$12 sps:$4 sm:$0xff]  }
  0x99   :  { %v1996_v27 = vld [vmem:[#allocation8 + $0x50] ss:$12 sps:$4 sm:$0xff]  }
  0x9b   :  { %1100 = vmatpush2.bf16.msra.mxu0 %v1966_v28  ;;  %1143 = vmatpush2.bf16.msra.mxu1 %v1969_v29  ;;  %v1997_v28 = vld [vmem:[#allocation8 + $0x1d0] ss:$12 sps:$4 sm:$0xff]   ;;  %v1998_v29 = vld [vmem:[#allocation8 + $0xf8] ss:$12 sps:$4 sm:$0xff]  }
  0x9c   :  { %1101 = vmatprep.subr.bf16.mxu0 %v1974_v30  ;;  %1144 = vmatprep.subr.bf16.mxu1 %v1977_v31  ;;  %v1999_v30 = vld [vmem:[#allocation8 + $0x278] ss:$12 sps:$4 sm:$0xff]  }
  0x9d   :  { %v2000_v31 = vld [vmem:[#allocation8 + $0x38] ss:$12 sps:$4 sm:$0xff]  }
  0x9f   :  { %1102 = vmatpush2.bf16.msra.mxu0 %v1972_v32  ;;  %1145 = vmatpush2.bf16.msra.mxu1 %v1975_v33  ;;  %v2001_v32 = vld [vmem:[#allocation8 + $0x1b8] ss:$12 sps:$4 sm:$0xff]   ;;  %v2002_v33 = vld [vmem:[#allocation8 + $0xe0] ss:$12 sps:$4 sm:$0xff]  }
  0xa0   :  { %1723 = vmatprep.subr.bf16.mxu0 %v1978_v34  ;;  %1745 = vmatprep.subr.bf16.mxu1 %v1979_v35  ;;  %v2003_v34 = vld [vmem:[#allocation8 + $0x260] ss:$12 sps:$4 sm:$0xff]  }
  0xa1   :  { %v2004_v35 = vld [vmem:[#allocation8 + $0x20] ss:$12 sps:$4 sm:$0xff]  }
 0x122   :  { %v350_v43 = vpop.f32.mrf.mxu0  ;;  %v393_v44 = vpop.f32.mrf.mxu1 }
 0x123   :  { %v351_v57 = vadd.f32 %v350_v43, %v133_v47  ;;  %v394_v58 = vadd.f32 %v393_v44, %v141_v48  ;;  %v2008_v43 = vld [vmem:[#allocation8 + $0x8] ss:$12 sps:$4 sm:$0xff]  }
 0x124   :  { %v352_v49 = vpop.f32.mrf.mxu0  ;;  %v395_v50 = vpop.f32.mrf.mxu1  ;;  %v2009_v44 = vld [vmem:[#allocation8 + $0x188] ss:$12 sps:$4 sm:$0xff]  }
 0x125   :  { %v353_v53 = vadd.f32 %v352_v49, %v137_v45  ;;  %v396_v54 = vadd.f32 %v395_v50, %v145_v46  ;;  %v402_v5 = vmax.f32 %v351_v57, 0.0  ;;  %v404_v6 = vmax.f32 %v394_v58, 0.0  ;;  %v2014_v49 = vld [vmem:[#allocation10 + $0x68] sm:$0xff]  }
 0x126   :  { %v354_v51 = vpop.f32.mrf.mxu0  ;;  %v397_v52 = vpop.f32.mrf.mxu1  ;;  %v2015_v50 = vld [vmem:[#allocation10 + $0x28] sm:$0xff]  }
 0x127   :  { %v355_v55 = vadd.f32 %v354_v51, %v133_v47  ;;  %v398_v56 = vadd.f32 %v397_v52, %v141_v48  ;;  %v403_v1 = vmax.f32 %v353_v53, 0.0  ;;  %v405_v2 = vmax.f32 %v396_v54, 0.0  ;;  %v2012_v47 = vld [vmem:[#allocation10 + $0x70] sm:$0xff]   ;;  %v2016_v51 = vld [vmem:[#allocation10 + $0x60] sm:$0xff]   ;;  %v2018_v53 = vld [vmem:[#allocation10 + $0x58] sm:$0xff]  }
 0x128   :  { %v356_v59 = vpop.f32.mrf.mxu0  ;;  %v399_v60 = vpop.f32.mrf.mxu1  ;;  %v2013_v48 = vld [vmem:[#allocation10 + $0x30] sm:$0xff]   ;;  %v2017_v52 = vld [vmem:[#allocation10 + $0x20] sm:$0xff]   ;;  %v2019_v54 = vld [vmem:[#allocation10 + $0x18] sm:$0xff]  }
 0x129   :  { %v357_v61 = vadd.f32 %v356_v59, %v137_v45  ;;  %v400_v62 = vadd.f32 %v399_v60, %v145_v46  ;;  %v406_v63 = vmax.f32 %v355_v55, 0.0  ;;  %v408_v0 = vmax.f32 %v398_v56, 0.0  ;;  %v2010_v45 = vld [vmem:[#allocation10 + $0x78] sm:$0xff]   ;;  %v2020_v55 = vld [vmem:[#allocation10 + $0x50] sm:$0xff]   ;;  %v2022_v57 = vld [vmem:[#allocation10 + $0x48] sm:$0xff]  }
 0x12a   :  { %v2011_v46 = vld [vmem:[#allocation10 + $0x38] sm:$0xff]   ;;  %v2021_v56 = vld [vmem:[#allocation10 + $0x10] sm:$0xff]   ;;  %v2023_v58 = vld [vmem:[#allocation10 + $0x8] sm:$0xff]  }
 0x12b   :  { %v407_v3 = vmax.f32 %v357_v61, 0.0  ;;  %v409_v4 = vmax.f32 %v400_v62, 0.0  ;;  %v2254_v11 = vpack.c.bf16 %v406_v63, %v402_v5  ;;  %v2256_v12 = vpack.c.bf16 %v408_v0, %v404_v6  ;;  %v2024_v59 = vld [vmem:[#allocation10 + $0x40] sm:$0xff]   ;;  %v2026_v61 = vld [vmem:[#allocation10 + $0xb8] sm:$0xff]   ;;  %v2027_v63 = vld [vmem:[#allocation10 + $0xb0] sm:$0xff]  }
 0x12c   :  { %v2025_v60 = vld [vmem:[#allocation10] sm:$0xff]   ;;  %v2178_v62 = vmov 0.0   ;;  %v2028_v0 = vld [vmem:[#allocation10 + $0xa8] sm:$0xff]   ;;  %v542_v6 = vld [vmem:[%s2284_s4] sm:$0x7] }
 0x12d   :  { %v411_v7 = vpack.c.bf16 %v407_v3, %v403_v1  ;;  %v413_v8 = vpack.c.bf16 %v409_v4, %v405_v2  ;;  %v2029_v1 = vld [vmem:[#allocation10 + $0xa0] sm:$0xff]   ;;  %v2030_v2 = vld [vmem:[#allocation10 + $0x98] sm:$0xff]   ;;  %v2031_v3 = vld [vmem:[#allocation10 + $0x90] sm:$0xff]  }
 0x12e   :  { %v2032_v4 = vld [vmem:[#allocation10 + $0x88] sm:$0xff]   ;;  %v2033_v5 = vld [vmem:[#allocation10 + $0x80] sm:$0xff]  }
 0x12f   :  { %1103 = vmatprep.mubr.bf16.mxu0 %v411_v7  ;;  %1146 = vmatprep.mubr.bf16.mxu1 %v413_v8 }
 0x130   :  { %1104 = vmatmul.mubr.bf16.vlgmr.msra.gmra.mxu0 %v2254_v11  ;;  %1147 = vmatmul.mubr.bf16.vlgmr.msra.gmra.mxu1 %v2256_v12 }
 0x131   :  { %1724 = vmatpush3.bf16.msra.mxu0 %v1980_v9  ;;  %1746 = vmatpush3.bf16.msra.mxu1 %v1981_v10 }
 0x132   :  { %1189 = vmatprep.mubr.bf16.mxu0 %v411_v7  ;;  %1230 = vmatprep.mubr.bf16.mxu1 %v413_v8  ;;  %v551_v7 = vrot.slane %v542_v6, %v136_v38  ;;  %v547_v8 = vrot.slane %v542_v6, %v132_v40 }
 0x133   :  { %1725 = vmatprep.subr.bf16.mxu0 %v1982_v13  ;;  %1747 = vmatprep.subr.bf16.mxu1 %v1983_v14 }
 0x135   :  { %1726 = vmatpush3.bf16.msra.mxu0 %v1984_v15  ;;  %1748 = vmatpush3.bf16.msra.mxu1 %v1985_v16 }
 0x136   :  { %1727 = vmatprep.subr.bf16.mxu0 %v1986_v17  ;;  %1749 = vmatprep.subr.bf16.mxu1 %v1987_v18 }
 0x139   :  { %1728 = vmatpush3.bf16.msra.mxu0 %v1988_v19  ;;  %1750 = vmatpush3.bf16.msra.mxu1 %v1989_v20 }
 0x13a   :  { %1729 = vmatprep.subr.bf16.mxu0 %v1990_v21  ;;  %1751 = vmatprep.subr.bf16.mxu1 %v1991_v22 }
 0x13d   :  { %1730 = vmatpush3.bf16.msra.mxu0 %v1992_v23  ;;  %1752 = vmatpush3.bf16.msra.mxu1 %v1993_v24 }
 0x13e   :  { %1731 = vmatprep.subr.bf16.mxu0 %v1994_v25  ;;  %1753 = vmatprep.subr.bf16.mxu1 %v1995_v26 }
 0x141   :  { %1732 = vmatpush3.bf16.msra.mxu0 %v1996_v27  ;;  %1754 = vmatpush3.bf16.msra.mxu1 %v1997_v28 }
 0x142   :  { %1733 = vmatprep.subr.bf16.mxu0 %v1998_v29  ;;  %1755 = vmatprep.subr.bf16.mxu1 %v1999_v30 }
 0x145   :  { %1734 = vmatpush3.bf16.msra.mxu0 %v2000_v31  ;;  %1756 = vmatpush3.bf16.msra.mxu1 %v2001_v32  ;;  %v555_v31 = vrot.slane %v542_v6, %v140_v41 }
 0x146   :  { %1735 = vmatprep.subr.bf16.mxu0 %v2002_v33  ;;  %1757 = vmatprep.subr.bf16.mxu1 %v2003_v34 }
 0x149   :  { %1736 = vmatpush3.bf16.msra.mxu0 %v2004_v35  ;;  %1758 = vmatpush3.bf16.msra.mxu1 %v2005_v36 }
 0x14a   :  { %1737 = vmatprep.subr.bf16.mxu0 %v2006_v39  ;;  %1759 = vmatprep.subr.bf16.mxu1 %v2007_v42 }
 0x14d   :  { %1738 = vmatpush3.bf16.msra.mxu0 %v2008_v43  ;;  %1760 = vmatpush3.bf16.msra.mxu1 %v2009_v44 }
 0x14e   :  { %1767 = vmatprep.subr.bf16.mxu0 %v2010_v45  ;;  %1798 = vmatprep.subr.bf16.mxu1 %v2178_v62 }
 0x150   :  { %1190 = vmatmul.mubr.bf16.vlgmr.msra.gmra.mxu0 %v2254_v11  ;;  %1231 = vmatmul.mubr.bf16.vlgmr.msra.gmra.mxu1 %v2256_v12 }
 0x151   :  { %1768 = vmatpush3.bf16.msra.mxu0 %v2011_v46  ;;  %1799 = vmatpush3.bf16.msra.mxu1 %v2026_v61 }
 0x152   :  { %1769 = vmatprep.subr.bf16.mxu0 %v2012_v47  ;;  %1800 = vmatprep.subr.bf16.mxu1 %v2178_v62 }
 0x153   :  { %1814 = vmatprep.mubr.msk.bf16.mxu1 %vm2179_vm0, %v2178_v62 }
 0x155   :  { %1770 = vmatpush3.bf16.msra.mxu0 %v2013_v48  ;;  %1801 = vmatpush3.bf16.msra.mxu1 %v2027_v63 }
 0x156   :  { %1771 = vmatprep.subr.bf16.mxu0 %v2014_v49  ;;  %1802 = vmatprep.subr.bf16.mxu1 %v2178_v62 }
 0x159   :  { %1772 = vmatpush3.bf16.msra.mxu0 %v2015_v50  ;;  %1803 = vmatpush3.bf16.msra.mxu1 %v2028_v0 }
 0x15a   :  { %1773 = vmatprep.subr.bf16.mxu0 %v2016_v51  ;;  %1804 = vmatprep.subr.bf16.mxu1 %v2178_v62 }
 0x15d   :  { %1774 = vmatpush3.bf16.msra.mxu0 %v2017_v52  ;;  %1805 = vmatpush3.bf16.msra.mxu1 %v2029_v1 }
 0x15e   :  { %1775 = vmatprep.subr.bf16.mxu0 %v2018_v53  ;;  %1806 = vmatprep.subr.bf16.mxu1 %v2178_v62 }
 0x161   :  { %1776 = vmatpush3.bf16.msra.mxu0 %v2019_v54  ;;  %1807 = vmatpush3.bf16.msra.mxu1 %v2030_v2 }
 0x162   :  { %1777 = vmatprep.subr.bf16.mxu0 %v2020_v55  ;;  %1808 = vmatprep.subr.bf16.mxu1 %v2178_v62 }
 0x165   :  { %1778 = vmatpush3.bf16.msra.mxu0 %v2021_v56  ;;  %1809 = vmatpush3.bf16.msra.mxu1 %v2031_v3  ;;  %v1689_v56 = vld [vmem:[%s2286_s6] ss:$0 sm:$0xff] }
 0x166   :  { %1779 = vmatprep.subr.bf16.mxu0 %v2022_v57  ;;  %1810 = vmatprep.subr.bf16.mxu1 %v2178_v62 }
 0x169   :  { %1780 = vmatpush3.bf16.msra.mxu0 %v2023_v58  ;;  %1811 = vmatpush3.bf16.msra.mxu1 %v2032_v4 }
 0x16a   :  { %1781 = vmatprep.subr.bf16.mxu0 %v2024_v59  ;;  %1812 = vmatprep.subr.bf16.mxu1 %v2178_v62 }
 0x16d   :  { %1782 = vmatpush3.bf16.msra.mxu0 %v2025_v60  ;;  %1813 = vmatpush3.bf16.msra.mxu1 %v2033_v5 }
 0x1f0   :  { %v1105_v9 = vpop.f32.mrf.mxu0  ;;  %v1148_v10 = vpop.f32.mrf.mxu1 }
 0x1f1   :  { %v1106_v14 = vadd.f32 %v1105_v9, %v547_v8 }
 0x1f2   :  { %v1107_v11 = vpop.f32.mrf.mxu0  ;;  %v1150_v12 = vpop.f32.mrf.mxu1 }
 0x1f3   :  { %v1108_v13 = vadd.f32 %v1107_v11, %v551_v7  ;;  %v1149_v22 = vadd.f32 %v1148_v10, %v1106_v14 }
 0x1f4   :  { %v1109_v15 = vpop.f32.mrf.mxu0  ;;  %v1152_v16 = vpop.f32.mrf.mxu1 }
 0x1f5   :  { %v1110_v17 = vadd.f32 %v1109_v15, %v547_v8  ;;  %v1151_v19 = vadd.f32 %v1150_v12, %v1108_v13  ;;  %v1239_v40 = vmax.f32 %v1149_v22, 0.0 }
 0x1f6   :  { %v1111_v18 = vpop.f32.mrf.mxu0  ;;  %v1154_v23 = vpop.f32.mrf.mxu1 }
 0x1f7   :  { %v1153_v20 = vadd.f32 %v1152_v16, %v1110_v17  ;;  %v1112_v21 = vadd.f32 %v1111_v18, %v551_v7  ;;  %v1240_v25 = vmax.f32 %v1151_v19, 0.0 }
 0x1f9   :  { %v1155_v24 = vadd.f32 %v1154_v23, %v1112_v21  ;;  %v1242_v38 = vmax.f32 %v1153_v20, 0.0 }
 0x1fb   :  { %v1243_v26 = vmax.f32 %v1155_v24, 0.0  ;;  %v1245_v28 = vpack.c.bf16 %v1242_v38, %v1239_v40 }
 0x1fd   :  { %v1246_v27 = vpack.c.bf16 %v1243_v26, %v1240_v25 }
 0x1ff   :  { %1479 = vmatprep.mubr.bf16.mxu0 %v1246_v27 }
 0x200   :  { %1480 = vmatmul.mubr.bf16.vlgmr.msra.gmra.mxu0 %v1245_v28 }
 0x210   :  { %v1739_v29 = vpop.f32.mrf.mxu0  ;;  %v1761_v30 = vpop.f32.mrf.mxu1 }
 0x212   :  { %v1740_v32 = vpop.f32.mrf.mxu0  ;;  %v1762_v33 = vpop.f32.mrf.mxu1 }
 0x213   :  { %v1741_v34 = vadd.f32 %v1740_v32, %v1739_v29  ;;  %v1763_v44 = vadd.f32 %v1762_v33, %v1761_v30 }
 0x214   :  { %v1742_v35 = vpop.f32.mrf.mxu0  ;;  %v1764_v36 = vpop.f32.mrf.mxu1 }
 0x215   :  { %v1192_v39 = vadd.f32 %v1741_v34, %v555_v31 }
 0x216   :  { %v1743_v42 = vpop.f32.mrf.mxu0  ;;  %v1765_v43 = vpop.f32.mrf.mxu1 }
 0x217   :  { %v1744_v45 = vadd.f32 %v1743_v42, %v1742_v35  ;;  %v1233_v46 = vadd.f32 %v1763_v44, %v1192_v39  ;;  %v1766_v48 = vadd.f32 %v1765_v43, %v1764_v36 }
 0x219   :  { %v1195_v47 = vadd.f32 %v1744_v45, %v555_v31  ;;  %v1241_v50 = vmax.f32 %v1233_v46, 0.0 }
 0x21b   :  { %v1236_v49 = vadd.f32 %v1766_v48, %v1195_v47 }
 0x21d   :  { %v1244_v51 = vmax.f32 %v1236_v49, 0.0 }
 0x21f   :  { %v1247_v52 = vpack.c.bf16 %v1244_v51, %v1241_v50 }
 0x221   :  { %1815 = vmatmul.mubr.bf16.vlgmr.msra.gmra.mxu1 %v1247_v52 }
 0x2c0   :  { %v1783_v37 = vpop.f32.mrf.mxu0 }
 0x2c2   :  { %v1784_v41 = vpop.f32.mrf.mxu0 }
 0x2c3   :  { %v1785_v54 = vadd.f32 %v1784_v41, %v1783_v37 }
 0x2c4   :  { %v1786_v53 = vpop.f32.mrf.mxu0 }
 0x2c5   :  { %v1482_v58 = vadd.f32 %v1785_v54, %v1689_v56 }
 0x2c6   :  { %v1787_v55 = vpop.f32.mrf.mxu0 }
 0x2c7   :  { %v1788_v57 = vadd.f32 %v1787_v55, %v1786_v53 }
 0x2c9   :  { %v1485_v62 = vadd.f32 %v1788_v57, %v1689_v56 }
 0x2e1   :  { %v1522_v59 = vpop.f32.mrf.mxu1 }
 0x2e2   :  { %v1523_v60 = vadd.f32 %v1522_v59, %v1482_v58 }
 0x2e3   :  { %v1816_v61 = vpop.f32.mrf.mxu1 }
 0x2e4   :  { %2034 = vtanh.f32 %v1523_v60 }
 0x2e5   :  { %v1525_v63 = vpop.f32.mrf.mxu1 }
 0x2e6   :  { %v1526_v0 = vadd.f32 %v1525_v63, %v1485_v62 }
 0x2e7   :  { %v1817_v1 = vpop.f32.mrf.mxu1 }
 0x2e8   :  { %2036 = vtanh.f32 %v1526_v0 }
 0x2f1   :  { %v2035_v2 = vpop.eup %2034 }
 0x2f5   :  { %v2037_v3 = vpop.eup %2036 }
 0x2f6   :  { %v1721_v4 = vpack.c.bf16 %v2037_v3, %v2035_v2 }
 0x2f8   :  { %1722 = vst [vmem:[#allocation11] sm:$0xff] %v1721_v4  }
 0x2f9   :  { %2149 = shalt.err (!%p2146_p1)
}
 0x2fa   :  { %1552 = dma.vmem_to_hbm [thread:$0]  %s1547_s8, 128, %s2287_s7, [#allocation4], %s2173_s17, %s2173_s17, %s2174_s18  }
 0x2fb   :  { %2164 = dma.done.wait [#allocation4], 128  }
 0x2fc   :  { %2165 = vsyncadd [#allocation4], 4294967168 }
 0x2fd   :  { %1556 = vsyncpa [#allocation3], 1 }
 0x2fe   :  { %1557 = vsyncpa [#allocation6], 1 }
 0x2ff   :  { %1558 = vsyncpa [#allocation9], 1 }
 0x300   :  { %1559 = vsyncpa [#allocation4], 1 }

</bundles_post_ra>
